<compile_context>
chip_gen: v6e
topology: v6e:2x2x1
jax: 0.10.0
libtpu: 0.0.40
codegen_flags: <defaults>
</compile_context>

<pallas_src>
import jax
import jax.numpy as jnp
from jax.experimental import pallas as pl
from jax.experimental.pallas import tpu as pltpu


# ----------------------------------------------------------------------------
# Kernel body
# ----------------------------------------------------------------------------
def _make_kernel(compute_dtype):
    """Elementwise relu6(x + 3) / 6 == clip(x + 3, 0, 6) * (1/6)."""

    def kernel(x_ref, o_ref):
        x = x_ref[...].astype(compute_dtype)  # no-op when dtypes match
        y = jnp.clip(x + 3.0, 0.0, 6.0) * (1.0 / 6.0)
        o_ref[...] = y.astype(o_ref.dtype)

    return kernel


# ----------------------------------------------------------------------------
# Chip-aware configuration
# ----------------------------------------------------------------------------
def _chip_config():
    """(target_block_bytes, vmem_limit_bytes_or_None, multi_tc, upcast_bf16)."""
    kind = ""
    try:
        kind = jax.devices()[0].device_kind.lower()
    except Exception:
        pass
    if "v7" in kind:
        # 6 MiB blocks -> 4 buffers (2x in + 2x out) = 24 MiB, under 32 MiB scoped.
        return 6 << 20, 32 << 20, True, False
    if "v6" in kind:
        # 4 MiB blocks -> 16 MiB total, under the 32 MiB default scoped VMEM.
        return 4 << 20, None, False, False
    if "v5" in kind:
        # 2 MiB blocks -> 8 MiB total, safely under v5e's 16 MiB scoped VMEM.
        # v5e VPU has no bf16, so upcast bf16 math to f32 there.
        return 2 << 20, None, False, True
    # Unknown part: conservative defaults.
    return 2 << 20, None, False, True


# ----------------------------------------------------------------------------
# Tiling helpers
# ----------------------------------------------------------------------------
_LANE_CANDIDATES = (8192, 4096, 2048, 1024, 512, 256, 128)
_ROW_ALIGN = 32  # safe block-row granularity for f32 / bf16 / int8 sublane packing


def _choose_cols(n_elems):
    """Pick a lane-dense width (multiple of 128) dividing n_elems exactly.

    Prefers widths whose row count is a multiple of 8 (full vreg sublanes),
    then widths with at least 8 rows, then any divisor. None if n % 128 != 0.
    """
    if n_elems % 128 != 0:
        return None
    for c in _LANE_CANDIDATES:
        if n_elems % c == 0 and (n_elems // c) % 8 == 0:
            return c
    for c in _LANE_CANDIDATES:
        if n_elems % c == 0 and (n_elems // c) >= 8:
            return c
    for c in _LANE_CANDIDATES:
        if n_elems % c == 0:
            return c
    return None


def _choose_tile_rows(rows, cols, itemsize, target_bytes, multi_tc):
    """Block rows: ~target_bytes per block, multiple of 32; balanced even grid
    on multi-TC parts, single full block on single-TC parts when it fits."""
    if rows <= _ROW_ALIGN:
        return int(rows)  # block == full array dims (always legal)
    tm = max(_ROW_ALIGN, (target_bytes // (cols * itemsize)) // _ROW_ALIGN * _ROW_ALIGN)
    tm = min(tm, rows)
    if multi_tc:
        nb = -(-rows // tm)
        if nb == 1 and rows >= 2 * _ROW_ALIGN:
            nb = 2                      # split so both TensorCores get work
        elif nb > 1 and nb % 2 == 1:
            nb += 1                     # even, balanced grid
        tm = -(-rows // nb)
        tm = -(-tm // _ROW_ALIGN) * _ROW_ALIGN
        tm = min(tm, rows)
    return int(tm)


# ----------------------------------------------------------------------------
# Odd-size path (element count not a multiple of 128): no pad / slice HBM passes.
# ----------------------------------------------------------------------------
def _h_sigmoid_odd(x_flat, n, dtype, compute_dtype, target_bytes, vmem_limit):
    itemsize = jnp.dtype(dtype).itemsize
    kernel = _make_kernel(compute_dtype)

    if n * itemsize <= (4 << 20):
        # Whole vector as a single full-extent VMEM block (no 128-divisibility
        # requirement when the block equals the full array).
        return pl.pallas_call(
            kernel,
            out_shape=jax.ShapeDtypeStruct((n,), dtype),
            in_specs=[pl.BlockSpec(memory_space=pltpu.MemorySpace.VMEM)],
            out_specs=pl.BlockSpec(memory_space=pltpu.MemorySpace.VMEM),
        )(x_flat)

    # Large odd size: ragged 1-D blocked grid; OOB writes of the last partial
    # block are dropped by Pallas, so no padding or slicing passes are needed.
    # TODO(synk): if 1-D ragged blocking is ever rejected by a toolchain, fall
    # back to a padded 2-D slab for this (rare) path.
    bn = max(8 * 128, (target_bytes // itemsize) // 1024 * 1024)
    return pl.pallas_call(
        kernel,
        out_shape=jax.ShapeDtypeStruct((n,), dtype),
        grid_spec=pltpu.PrefetchScalarGridSpec(
            num_scalar_prefetch=0,
            grid=(pl.cdiv(n, bn),),
            in_specs=[pl.BlockSpec((bn,), lambda i: (i,))],
            out_specs=pl.BlockSpec((bn,), lambda i: (i,)),
        ),
        compiler_params=pltpu.CompilerParams(
            dimension_semantics=("parallel",),
            vmem_limit_bytes=vmem_limit,
        ),
        cost_estimate=pl.CostEstimate(
            flops=4 * n, transcendentals=0, bytes_accessed=2 * n * itemsize
        ),
    )(x_flat)


# ----------------------------------------------------------------------------
# Public entry point
# ----------------------------------------------------------------------------
def h_sigmoid(x: jax.Array) -> jax.Array:
    """Elementwise hard-sigmoid: relu6(x + 3) / 6. Accepts NCHW (or any shape)."""
    orig_shape = x.shape
    dtype = x.dtype
    if not jnp.issubdtype(dtype, jnp.floating):
        raise TypeError("h_sigmoid expects a floating-point input")
    n = x.size
    if n == 0:
        return x
    itemsize = jnp.dtype(dtype).itemsize

    target_bytes, vmem_limit, multi_tc, upcast_bf16 = _chip_config()

    # Keep bf16 math native on v6e/v7x; upcast on v5e (no bf16 VPU) and for any
    # other narrow float dtype.
    if dtype == jnp.float32:
        compute_dtype = jnp.float32
    elif dtype == jnp.bfloat16 and not upcast_bf16:
        compute_dtype = jnp.bfloat16
    else:
        compute_dtype = jnp.float32

    cols = _choose_cols(n)
    if cols is None:
        out_flat = _h_sigmoid_odd(
            x.reshape(-1), n, dtype, compute_dtype, target_bytes, vmem_limit
        )
        return out_flat.reshape(orig_shape)

    # Common case: free reshape of contiguous data into a lane-dense 2-D slab.
    rows = n // cols
    x2d = x.reshape(rows, cols)
    tm = _choose_tile_rows(rows, cols, itemsize, target_bytes, multi_tc)
    grid = (pl.cdiv(rows, tm),)  # ragged last block: OOB writes are dropped

    out2d = pl.pallas_call(
        _make_kernel(compute_dtype),
        out_shape=jax.ShapeDtypeStruct((rows, cols), dtype),
        grid_spec=pltpu.PrefetchScalarGridSpec(
            num_scalar_prefetch=0,
            grid=grid,
            in_specs=[pl.BlockSpec((tm, cols), lambda i: (i, 0))],
            out_specs=pl.BlockSpec((tm, cols), lambda i: (i, 0)),
        ),
        compiler_params=pltpu.CompilerParams(
            dimension_semantics=("parallel",),  # shards blocks across TCs on v7x
            vmem_limit_bytes=vmem_limit,
        ),
        cost_estimate=pl.CostEstimate(
            flops=4 * n, transcendentals=0, bytes_accessed=2 * n * itemsize
        ),
    )(x2d)

    return out2d.reshape(orig_shape)


if __name__ == "__main__":
    key = jax.random.PRNGKey(0)
    # Small NCHW input consistent with typical conv activations.
    x = jax.random.normal(key, (2, 4, 16, 16), dtype=jnp.float32) * 4.0

    y = h_sigmoid(x)
    y = jax.block_until_ready(y)

    # Reference check in plain JAX.
    ref = jnp.clip(x + 3.0, 0.0, 6.0) / 6.0
    assert y.shape == x.shape and y.dtype == x.dtype
    assert jnp.allclose(y, ref, atol=1e-6), "mismatch vs reference"

    print("KERNEL_OK")
</pallas_src>

<mosaic_0001>
module attributes {stable_mosaic.version = 11 : i64} {
  func.func @kernel(%arg0: i32, %arg1: memref<8x256xf32, #tpu.memory_space<vmem>>, %arg2: memref<8x256xf32, #tpu.memory_space<vmem>>) attributes {dimension_semantics = [#tpu.dimension_semantics<parallel>], iteration_bounds = array<i64: 1>, scalar_prefetch = 0 : i64, scratch_operands = 0 : i64, tpu.core_type = #tpu.core_type<tc>, window_params = [{transform_indices = @transform_0, window_bounds = array<i64: 8, 256>}, {transform_indices = @transform_1, window_bounds = array<i64: 8, 256>}]} {
    %c0 = arith.constant 0 : index
    %c0_0 = arith.constant 0 : index
    %0 = vector.load %arg1[%c0, %c0_0] : memref<8x256xf32, #tpu.memory_space<vmem>>, vector<8x256xf32>
    %cst = arith.constant 3.000000e+00 : f32
    %1 = vector.broadcast %cst : f32 to vector<8x256xf32>
    %2 = arith.addf %0, %1 : vector<8x256xf32>
    %cst_1 = arith.constant 0.000000e+00 : f32
    %cst_2 = arith.constant 6.000000e+00 : f32
    %3 = vector.broadcast %cst_1 : f32 to vector<8x256xf32>
    %4 = arith.maximumf %3, %2 : vector<8x256xf32>
    %5 = vector.broadcast %cst_2 : f32 to vector<8x256xf32>
    %6 = arith.minimumf %5, %4 : vector<8x256xf32>
    %cst_3 = arith.constant 0.166666672 : f32
    %7 = vector.broadcast %cst_3 : f32 to vector<8x256xf32>
    %8 = arith.mulf %6, %7 : vector<8x256xf32>
    %c0_4 = arith.constant 0 : index
    %c0_5 = arith.constant 0 : index
    %9 = vector.load %arg2[%c0_4, %c0_5] : memref<8x256xf32, #tpu.memory_space<vmem>>, vector<8x256xf32>
    tpu.vector_store %arg2[%c0_4, %c0_5], %8 {strides = array<i32>} : memref<8x256xf32, #tpu.memory_space<vmem>>, vector<8x256xf32>,
    return
  }
  func.func @transform_0(%arg0: i32) -> (i32, i32) {
    %c0_i32 = arith.constant 0 : i32
    %c0_i32_0 = arith.constant 0 : i32
    return %arg0, %c0_i32 : i32, i32
  }
  func.func @transform_1(%arg0: i32) -> (i32, i32) {
    %c0_i32 = arith.constant 0 : i32
    %c0_i32_0 = arith.constant 0 : i32
    return %arg0, %c0_i32 : i32, i32
  }
}

</mosaic_0001>

<bundles_post_ra>
// kernel: tpu_custom_call.1
= control target key start
LH: loop header
LB: loop body
LE: loop exit
PB: predicated region body
PF: predicated region fallthrough
CT: control target
= control target key end

     0   :  { %6 = vsyncpa [#allocation3], 0  ;;  %s112_s0 = inlined_call_operand.hbm [shape: f32[8,256], index: 0, kind: input, shape index: {}]   ;;  %s113_s1 = inlined_call_operand.hbm [shape: f32[8,256], index: 1, kind: output, shape index: {}]  }
   0x1   :  { %7 = vsyncpa [#allocation4], 0  ;;  %s94_s6 = smov [#allocation2]  }
   0x2   :  { %s14_s7 = sshll.u32 %s94_s6, 4  ;;  %s15_s7 = int_to_ptr.vmem [resolvable:$true] %s14_s7 }
   0x3   :  { %s58_s8 = scalar_lea.vmem %s15_s7, 256  ;;  %p63_p1 = scmp.lt.s32.totalorder %s15_s7, %s15_s7 }
   0x4   :  { %p59_p0 = scmp.ne.s32.totalorder %s15_s7, %s58_s8  ;;  %p64_p2 = scmp.lt.s32.totalorder %s58_s8, %s58_s8 }
   0x6   :  { %p65_p3 = por %p64_p2, %p63_p1 }
   0x8   :  { %p66_p4 = pnand %p65_p3, %p59_p0 }
   0xa   :  { %69 = shalt.err (!%p66_p4)
}
   0xb   :  { %17 = dma.hbm_to_vmem [thread:$0]  %s112_s0, 256, %s15_s7, [#allocation3]  }
   0xc   :  { %90 = dma.done.wait [#allocation3], 256  }
   0xd   :  { %91 = vsyncadd [#allocation3], 4294967040  ;;  %v21_v0 = vld [vmem:[#allocation2] sm:$0xff]  ;;  %v22_v1 = vld [vmem:[#allocation2 + $0x8] sm:$0xff]  ;;  %s95_s11 = smov [#allocation5]  }
   0xe   :  { %v23_v2 = vadd.f32 3.0, %v21_v0  ;;  %v24_v3 = vadd.f32 3.0, %v22_v1  ;;  %s39_s12 = sshll.u32 %s95_s11, 4  ;;  %s40_s12 = int_to_ptr.vmem [resolvable:$true] %s39_s12 }
   0xf   :  { %s70_s13 = scalar_lea.vmem %s40_s12, 256  ;;  %p75_p6 = scmp.lt.s32.totalorder %s40_s12, %s40_s12 }
  0x10   :  { %v25_v4 = vmax.f32 %v23_v2, 0.0  ;;  %v26_v5 = vmax.f32 %v24_v3, 0.0  ;;  %p71_p5 = scmp.ne.s32.totalorder %s40_s12, %s70_s13  ;;  %p76_p7 = scmp.lt.s32.totalorder %s70_s13, %s70_s13 }
  0x12   :  { %v27_v6 = vmin.f32 %v25_v4, 6.0  ;;  %v28_v7 = vmin.f32 %v26_v5, 6.0  ;;  %p77_p8 = por %p76_p7, %p75_p6 }
  0x14   :  { %v29_v8 = vmul.f32 0.16666667, %v27_v6  ;;  %v30_v9 = vmul.f32 0.16666667, %v28_v7  ;;  %p78_p9 = pnand %p77_p8, %p71_p5 }
  0x16   :  { %31 = vst [vmem:[#allocation5] sm:$0xff] %v29_v8  ;;  %32 = vst [vmem:[#allocation5 + $0x8] sm:$0xff] %v30_v9 }
  0x17   :  { %81 = shalt.err (!%p78_p9)
}
  0x18   :  { %42 = dma.vmem_to_hbm [thread:$0]  %s40_s12, 256, %s113_s1, [#allocation4]  }
  0x19   :  { %92 = dma.done.wait [#allocation4], 256  }
  0x1a   :  { %93 = vsyncadd [#allocation4], 4294967040 }
  0x1b   :  { %46 = vsyncpa [#allocation3], 1 }
  0x1c   :  { %47 = vsyncpa [#allocation4], 1 }

</bundles_post_ra>
